<compile_context>
chip_gen: v5e
topology: v5e:2x2
jax: 0.10.0
libtpu: 0.0.40
codegen_flags: <defaults>
</compile_context>

<pallas_src>
import functools

import jax
import jax.numpy as jnp
from jax.experimental import pallas as pl
from jax.experimental.pallas import tpu as pltpu

_LANES = 128


def _max_tile_rows() -> int:
    """Row-tile cap: larger on v7x-class chips (fast HBM, smaller VMEM)."""
    try:
        info = pltpu.get_tpu_info()
        vmem = int(getattr(info, "vmem_capacity_bytes", 0))
        if 0 < vmem <= 64 * 1024 * 1024:
            # v7x: 3.2 TB/s HBM -> bigger tiles amortize per-grid-step
            # overhead; 2 inputs x 2 buffers x 2 MiB = 8 MiB VMEM (fits).
            return 4096
    except Exception:
        pass
    return 2048


def _pick_tile_rows(r: int, cap: int) -> int:
    """Pick the row-tile size.

    Prefers (a) the full extent when it fits, else (b) the largest multiple of
    8 <= cap that divides r (no ragged tile -> mask code elided), else (c) the
    cap itself with the ragged last tile masked behind pl.when.
    """
    if r <= cap:
        return r  # full dim -> always a legal block shape
    cap8 = (cap // 8) * 8
    for t in range(cap8, 7, -8):
        if r % t == 0:
            if t >= max(8, cap8 // 2):
                return t
            break
    return cap8


def _tversky_sums_kernel(prob_ref, ref_ref, out_ref, tp_acc, sp_acc, sr_acc,
                         *, rows_total: int, rows_tile: int, partial_sum: bool):
    """Grid = (C, N, T).  Each step folds one (rows_tile, 128) tile of one
    channel of one batch element into small per-channel accumulators and, on
    the channel's last step, emits (tp, sum(prob), sum(ref)) lane-dense."""
    ni = pl.program_id(1)
    ti = pl.program_id(2)
    n_last = pl.num_programs(1) - 1
    t_last = pl.num_programs(2) - 1

    # Reset per-channel accumulators at the start of each channel's sweep.
    @pl.when((ni == 0) & (ti == 0))
    def _():
        tp_acc[...] = jnp.zeros_like(tp_acc)
        sp_acc[...] = jnp.zeros_like(sp_acc)
        sr_acc[...] = jnp.zeros_like(sr_acc)

    prob_t = prob_ref[...].astype(jnp.float32)   # (rows_tile, 128)
    ref_t = ref_ref[...].astype(jnp.float32)

    def accumulate(p, rf):
        prod = rf * p                             # one multiply per element
        if partial_sum:
            # Free, (8,128)-tile-aligned reshape; sum(0) is pure VALU adds.
            g = rows_tile // 8
            tp_acc[...] += prod.reshape(g, 8, _LANES).sum(axis=0)
            sp_acc[...] += p.reshape(g, 8, _LANES).sum(axis=0)
            sr_acc[...] += rf.reshape(g, 8, _LANES).sum(axis=0)
        else:
            # Small / odd row count (rows_tile == rows_total < cap, not a
            # multiple of 8): tiny accumulator, elementwise accumulate.
            tp_acc[...] += prod
            sp_acc[...] += p
            sr_acc[...] += rf

    rem = rows_total % rows_tile
    if rem == 0:
        accumulate(prob_t, ref_t)
    else:
        # Keep the mask VALU filler off the hot path: interior tiles take the
        # unmasked branch, only the ragged last tile pays for iota/compare.
        @pl.when(ti != t_last)
        def _():
            accumulate(prob_t, ref_t)

        @pl.when(ti == t_last)
        def _():
            row_ids = jax.lax.broadcasted_iota(jnp.int32, (rows_tile, _LANES), 0)
            mask = row_ids < rem
            accumulate(jnp.where(mask, prob_t, 0.0),
                       jnp.where(mask, ref_t, 0.0))

    # Finalize once per channel: emit the three raw sums (rows 0/1/2 of a
    # lane-dense (8,128) block).  The Tversky arithmetic lives in the JAX
    # epilogue.
    @pl.when((ni == n_last) & (ti == t_last))
    def _():
        tp = jnp.sum(tp_acc[...])
        sp = jnp.sum(sp_acc[...])
        sr = jnp.sum(sr_acc[...])
        row = jax.lax.broadcasted_iota(jnp.int32, (8, _LANES), 0)
        out_ref[...] = jnp.where(
            row == 0, tp, jnp.where(row == 1, sp, jnp.where(row == 2, sr, 0.0)))


def tversky_loss(output, y_true, compare_rule='>', thr=0.95, beta=0.3,
                 weights=None):
    """Pallas equivalent of tversky_loss.forward.

    output, y_true: (N, C, H, W).  compare_rule / thr / weights are unused by
    the reference forward (kept for signature parity).  Returns scalar f32.
    """
    n, c, h, w = output.shape
    l = h * w

    # Free reshapes only: keep NCHW layout, split the contiguous per-(n,c)
    # chunk of H*W elements into (rows, 128) lane-dense tiles.
    prob = output.reshape(n, c, l)
    ref = y_true.reshape(n, c, l)

    l_pad = pl.cdiv(l, _LANES) * _LANES
    if l_pad != l:
        # Rare fallback (H*W not a multiple of 128).  Zero padding contributes
        # nothing to tp / sum(prob) / sum(ref), so it is exact.
        prob = jnp.pad(prob, ((0, 0), (0, 0), (0, l_pad - l)))
        ref = jnp.pad(ref, ((0, 0), (0, 0), (0, l_pad - l)))

    r = l_pad // _LANES
    prob = prob.reshape(n, c, r, _LANES)
    ref = ref.reshape(n, c, r, _LANES)

    cap = _max_tile_rows()
    tr = _pick_tile_rows(r, cap)
    t_tiles = pl.cdiv(r, tr)
    partial_sum = (tr % 8 == 0)
    acc_rows = 8 if partial_sum else tr

    kernel = functools.partial(_tversky_sums_kernel, rows_total=r,
                               rows_tile=tr, partial_sum=partial_sum)

    # VMEM budget from the actual buffers: 2 pipeline buffers per input,
    # 3 small accumulators, tiny output; plus headroom for compiler scratch.
    in_bytes = 2 * tr * _LANES * (prob.dtype.itemsize + ref.dtype.itemsize)
    acc_bytes = 3 * acc_rows * _LANES * 4
    out_bytes = 2 * 8 * _LANES * 4
    vmem_limit = min(max(in_bytes + acc_bytes + out_bytes + 4 * 1024 * 1024,
                         16 * 1024 * 1024),
                     48 * 1024 * 1024)

    sums = pl.pallas_call(
        kernel,
        out_shape=jax.ShapeDtypeStruct((c, 8, _LANES), jnp.float32),
        grid_spec=pltpu.PrefetchScalarGridSpec(
            num_scalar_prefetch=0,
            grid=(c, n, t_tiles),
            in_specs=[
                pl.BlockSpec((None, None, tr, _LANES),
                             lambda ci, ni, ti: (ni, ci, ti, 0)),
                pl.BlockSpec((None, None, tr, _LANES),
                             lambda ci, ni, ti: (ni, ci, ti, 0)),
            ],
            out_specs=pl.BlockSpec((None, 8, _LANES),
                                   lambda ci, ni, ti: (ci, 0, 0)),
            scratch_shapes=[
                pltpu.VMEM((acc_rows, _LANES), jnp.float32),   # sum(ref*prob)
                pltpu.VMEM((acc_rows, _LANES), jnp.float32),   # sum(prob)
                pltpu.VMEM((acc_rows, _LANES), jnp.float32),   # sum(ref)
            ],
        ),
        compiler_params=pltpu.CompilerParams(
            dimension_semantics=("parallel", "arbitrary", "arbitrary"),
            vmem_limit_bytes=vmem_limit,
        ),
    )(prob, ref)

    # Tiny JAX epilogue: derive fp/fn per channel and average the loss terms.
    smooth = 1e-09
    alpha = 1.0 - beta
    tp = sums[:, 0, 0]
    sp = sums[:, 1, 0]
    sr = sums[:, 2, 0]
    fp = sp - tp                       # sum((1-ref)*prob)
    fn = sr - tp                       # sum(ref*(1-prob))
    tversky = (tp + smooth) / (tp + alpha * fp + beta * fn + smooth)
    return jnp.sum(1.0 - tversky) / c


def _tversky_loss_ref(output, y_true, beta=0.3):
    """Pure-JAX reference mirroring the PyTorch per-channel loop."""
    smooth = 1e-09
    num = output.shape[1]
    loss = 0.0
    for ch in range(num):
        prob = output[:, ch].reshape(-1).astype(jnp.float32)
        ref = y_true[:, ch].reshape(-1).astype(jnp.float32)
        alpha = 1.0 - beta
        tp = jnp.sum(ref * prob)
        fp = jnp.sum((1.0 - ref) * prob)
        fn = jnp.sum(ref * (1.0 - prob))
        tversky = (tp + smooth) / (tp + alpha * fp + beta * fn + smooth)
        loss = loss + (1.0 - tversky)
    return loss / num


if __name__ == "__main__":
    key = jax.random.PRNGKey(0)
    k1, k2 = jax.random.split(key)

    N, C, H, W = 2, 4, 16, 16
    # "output": soft probabilities in [0, 1); "y_true": binary masks.
    output = jax.random.uniform(k1, (N, C, H, W), dtype=jnp.float32)
    y_true = (jax.random.uniform(k2, (N, C, H, W), dtype=jnp.float32) > 0.5
              ).astype(jnp.float32)

    loss = jax.block_until_ready(tversky_loss(output, y_true, beta=0.3))
    loss_ref = jax.block_until_ready(_tversky_loss_ref(output, y_true, beta=0.3))

    assert jnp.allclose(loss, loss_ref, atol=1e-5, rtol=1e-5), (loss, loss_ref)
    print("KERNEL_OK")
</pallas_src>

<mosaic_0001>
module attributes {stable_mosaic.version = 11 : i64} {
  func.func @_tversky_sums_kernel(%arg0: i32, %arg1: i32, %arg2: i32, %arg3: memref<1x1x2x128xf32, #tpu.memory_space<vmem>>, %arg4: memref<1x1x2x128xf32, #tpu.memory_space<vmem>>, %arg5: memref<1x8x128xf32, #tpu.memory_space<vmem>>, %arg6: memref<2x128xf32, #tpu.memory_space<vmem>>, %arg7: memref<2x128xf32, #tpu.memory_space<vmem>>, %arg8: memref<2x128xf32, #tpu.memory_space<vmem>>) attributes {dimension_semantics = [#tpu.dimension_semantics<parallel>, #tpu.dimension_semantics<arbitrary>, #tpu.dimension_semantics<arbitrary>], iteration_bounds = array<i64: 4, 2, 1>, scalar_prefetch = 0 : i64, scratch_operands = 3 : i64, tpu.core_type = #tpu.core_type<tc>, window_params = [{transform_indices = @transform_0, window_bounds = array<i64: 1, 1, 2, 128>}, {transform_indices = @transform_1, window_bounds = array<i64: 1, 1, 2, 128>}, {transform_indices = @transform_2, window_bounds = array<i64: 1, 8, 128>}]} {
    %c0_i32 = arith.constant 0 : i32
    %0 = arith.cmpi eq, %arg1, %c0_i32 : i32
    %c0_i32_0 = arith.constant 0 : i32
    %1 = arith.cmpi eq, %arg2, %c0_i32_0 : i32
    %2 = arith.andi %0, %1 : i1
    %3 = arith.extui %2 : i1 to i32
    %c0_i32_1 = arith.constant 0 : i32
    %4 = arith.cmpi ne, %3, %c0_i32_1 : i32
    scf.if %4 {
      %cst = arith.constant 0.000000e+00 : f32
      %24 = vector.broadcast %cst : f32 to vector<2x128xf32>
      %c0_23 = arith.constant 0 : index
      %c0_24 = arith.constant 0 : index
      %25 = vector.load %arg6[%c0_23, %c0_24] : memref<2x128xf32, #tpu.memory_space<vmem>>, vector<2x128xf32>
      tpu.vector_store %arg6[%c0_23, %c0_24], %24 {strides = array<i32>} : memref<2x128xf32, #tpu.memory_space<vmem>>, vector<2x128xf32>,
      %cst_25 = arith.constant 0.000000e+00 : f32
      %26 = vector.broadcast %cst_25 : f32 to vector<2x128xf32>
      %c0_26 = arith.constant 0 : index
      %c0_27 = arith.constant 0 : index
      %27 = vector.load %arg7[%c0_26, %c0_27] : memref<2x128xf32, #tpu.memory_space<vmem>>, vector<2x128xf32>
      tpu.vector_store %arg7[%c0_26, %c0_27], %26 {strides = array<i32>} : memref<2x128xf32, #tpu.memory_space<vmem>>, vector<2x128xf32>,
      %cst_28 = arith.constant 0.000000e+00 : f32
      %28 = vector.broadcast %cst_28 : f32 to vector<2x128xf32>
      %c0_29 = arith.constant 0 : index
      %c0_30 = arith.constant 0 : index
      %29 = vector.load %arg8[%c0_29, %c0_30] : memref<2x128xf32, #tpu.memory_space<vmem>>, vector<2x128xf32>
      tpu.vector_store %arg8[%c0_29, %c0_30], %28 {strides = array<i32>} : memref<2x128xf32, #tpu.memory_space<vmem>>, vector<2x128xf32>,
    } else {
    }
    %c0 = arith.constant 0 : index
    %c0_2 = arith.constant 0 : index
    %c0_3 = arith.constant 0 : index
    %c0_4 = arith.constant 0 : index
    %5 = vector.load %arg3[%c0, %c0_2, %c0_3, %c0_4] : memref<1x1x2x128xf32, #tpu.memory_space<vmem>>, vector<1x1x2x128xf32>
    %6 = vector.shape_cast %5 : vector<1x1x2x128xf32> to vector<2x128xf32>
    %c0_5 = arith.constant 0 : index
    %c0_6 = arith.constant 0 : index
    %c0_7 = arith.constant 0 : index
    %c0_8 = arith.constant 0 : index
    %7 = vector.load %arg4[%c0_5, %c0_6, %c0_7, %c0_8] : memref<1x1x2x128xf32, #tpu.memory_space<vmem>>, vector<1x1x2x128xf32>
    %8 = vector.shape_cast %7 : vector<1x1x2x128xf32> to vector<2x128xf32>
    %9 = arith.mulf %8, %6 : vector<2x128xf32>
    %c0_9 = arith.constant 0 : index
    %c0_10 = arith.constant 0 : index
    %10 = vector.load %arg6[%c0_9, %c0_10] : memref<2x128xf32, #tpu.memory_space<vmem>>, vector<2x128xf32>
    %11 = arith.addf %10, %9 : vector<2x128xf32>
    %c0_11 = arith.constant 0 : index
    %c0_12 = arith.constant 0 : index
    %12 = vector.load %arg6[%c0_11, %c0_12] : memref<2x128xf32, #tpu.memory_space<vmem>>, vector<2x128xf32>
    tpu.vector_store %arg6[%c0_11, %c0_12], %11 {strides = array<i32>} : memref<2x128xf32, #tpu.memory_space<vmem>>, vector<2x128xf32>,
    %c0_13 = arith.constant 0 : index
    %c0_14 = arith.constant 0 : index
    %13 = vector.load %arg7[%c0_13, %c0_14] : memref<2x128xf32, #tpu.memory_space<vmem>>, vector<2x128xf32>
    %14 = arith.addf %13, %6 : vector<2x128xf32>
    %c0_15 = arith.constant 0 : index
    %c0_16 = arith.constant 0 : index
    %15 = vector.load %arg7[%c0_15, %c0_16] : memref<2x128xf32, #tpu.memory_space<vmem>>, vector<2x128xf32>
    tpu.vector_store %arg7[%c0_15, %c0_16], %14 {strides = array<i32>} : memref<2x128xf32, #tpu.memory_space<vmem>>, vector<2x128xf32>,
    %c0_17 = arith.constant 0 : index
    %c0_18 = arith.constant 0 : index
    %16 = vector.load %arg8[%c0_17, %c0_18] : memref<2x128xf32, #tpu.memory_space<vmem>>, vector<2x128xf32>
    %17 = arith.addf %16, %8 : vector<2x128xf32>
    %c0_19 = arith.constant 0 : index
    %c0_20 = arith.constant 0 : index
    %18 = vector.load %arg8[%c0_19, %c0_20] : memref<2x128xf32, #tpu.memory_space<vmem>>, vector<2x128xf32>
    tpu.vector_store %arg8[%c0_19, %c0_20], %17 {strides = array<i32>} : memref<2x128xf32, #tpu.memory_space<vmem>>, vector<2x128xf32>,
    %c1_i32 = arith.constant 1 : i32
    %19 = arith.cmpi eq, %arg1, %c1_i32 : i32
    %c0_i32_21 = arith.constant 0 : i32
    %20 = arith.cmpi eq, %arg2, %c0_i32_21 : i32
    %21 = arith.andi %19, %20 : i1
    %22 = arith.extui %21 : i1 to i32
    %c0_i32_22 = arith.constant 0 : i32
    %23 = arith.cmpi ne, %22, %c0_i32_22 : i32
    scf.if %23 {
      %c0_23 = arith.constant 0 : index
      %c0_24 = arith.constant 0 : index
      %24 = vector.load %arg6[%c0_23, %c0_24] : memref<2x128xf32, #tpu.memory_space<vmem>>, vector<2x128xf32>
      %25 = vector.shape_cast %24 : vector<2x128xf32> to vector<1x2x128xf32>
      %cst = arith.constant dense<0.000000e+00> : vector<1xf32>
      %26 = vector.multi_reduction <add>, %25, %cst [1, 2] : vector<1x2x128xf32> to vector<1xf32>
      %27 = vector.shape_cast %26 : vector<1xf32> to vector<1x1x1xf32>
      %28 = vector.extract %27[0, 0, 0] : f32 from vector<1x1x1xf32>
      %c0_25 = arith.constant 0 : index
      %c0_26 = arith.constant 0 : index
      %29 = vector.load %arg7[%c0_25, %c0_26] : memref<2x128xf32, #tpu.memory_space<vmem>>, vector<2x128xf32>
      %30 = vector.shape_cast %29 : vector<2x128xf32> to vector<1x2x128xf32>
      %cst_27 = arith.constant dense<0.000000e+00> : vector<1xf32>
      %31 = vector.multi_reduction <add>, %30, %cst_27 [1, 2] : vector<1x2x128xf32> to vector<1xf32>
      %32 = vector.shape_cast %31 : vector<1xf32> to vector<1x1x1xf32>
      %33 = vector.extract %32[0, 0, 0] : f32 from vector<1x1x1xf32>
      %c0_28 = arith.constant 0 : index
      %c0_29 = arith.constant 0 : index
      %34 = vector.load %arg8[%c0_28, %c0_29] : memref<2x128xf32, #tpu.memory_space<vmem>>, vector<2x128xf32>
      %35 = vector.shape_cast %34 : vector<2x128xf32> to vector<1x2x128xf32>
      %cst_30 = arith.constant dense<0.000000e+00> : vector<1xf32>
      %36 = vector.multi_reduction <add>, %35, %cst_30 [1, 2] : vector<1x2x128xf32> to vector<1xf32>
      %37 = vector.shape_cast %36 : vector<1xf32> to vector<1x1x1xf32>
      %38 = vector.extract %37[0, 0, 0] : f32 from vector<1x1x1xf32>
      %39 = tpu.iota {dimensions = array<i32: 0>} : vector<8x128xi32>
      %c0_i32_31 = arith.constant 0 : i32
      %40 = vector.broadcast %c0_i32_31 : i32 to vector<8x128xi32>
      %41 = arith.cmpi eq, %39, %40 : vector<8x128xi32>
      %c1_i32_32 = arith.constant 1 : i32
      %42 = vector.broadcast %c1_i32_32 : i32 to vector<8x128xi32>
      %43 = arith.cmpi eq, %39, %42 : vector<8x128xi32>
      %c2_i32 = arith.constant 2 : i32
      %44 = vector.broadcast %c2_i32 : i32 to vector<8x128xi32>
      %45 = arith.cmpi eq, %39, %44 : vector<8x128xi32>
      %cst_33 = arith.constant 0.000000e+00 : f32
      %46 = vector.broadcast %38 : f32 to vector<8x128xf32>
      %47 = vector.broadcast %cst_33 : f32 to vector<8x128xf32>
      %48 = arith.select %45, %46, %47 : vector<8x128xi1>, vector<8x128xf32>
      %49 = vector.broadcast %33 : f32 to vector<8x128xf32>
      %50 = arith.select %43, %49, %48 : vector<8x128xi1>, vector<8x128xf32>
      %51 = vector.broadcast %28 : f32 to vector<8x128xf32>
      %52 = arith.select %41, %51, %50 : vector<8x128xi1>, vector<8x128xf32>
      %c0_34 = arith.constant 0 : index
      %c0_35 = arith.constant 0 : index
      %c0_36 = arith.constant 0 : index
      %53 = vector.load %arg5[%c0_34, %c0_35, %c0_36] : memref<1x8x128xf32, #tpu.memory_space<vmem>>, vector<1x8x128xf32>
      %54 = vector.shape_cast %53 : vector<1x8x128xf32> to vector<8x128xf32>
      %55 = vector.shape_cast %52 : vector<8x128xf32> to vector<1x8x128xf32>
      tpu.vector_store %arg5[%c0_34, %c0_35, %c0_36], %55 {strides = array<i32>} : memref<1x8x128xf32, #tpu.memory_space<vmem>>, vector<1x8x128xf32>,
    } else {
    }
    return
  }
  func.func @transform_0(%arg0: i32, %arg1: i32, %arg2: i32) -> (i32, i32, i32, i32) {
    %c0_i32 = arith.constant 0 : i32
    %c0_i32_0 = arith.constant 0 : i32
    return %arg1, %arg0, %arg2, %c0_i32 : i32, i32, i32, i32
  }
  func.func @transform_1(%arg0: i32, %arg1: i32, %arg2: i32) -> (i32, i32, i32, i32) {
    %c0_i32 = arith.constant 0 : i32
    %c0_i32_0 = arith.constant 0 : i32
    return %arg1, %arg0, %arg2, %c0_i32 : i32, i32, i32, i32
  }
  func.func @transform_2(%arg0: i32, %arg1: i32, %arg2: i32) -> (i32, i32, i32) {
    %c0_i32 = arith.constant 0 : i32
    %c0_i32_0 = arith.constant 0 : i32
    %c0_i32_1 = arith.constant 0 : i32
    return %arg0, %c0_i32, %c0_i32_0 : i32, i32, i32
  }
}

</mosaic_0001>

<bundles_post_ra>
// kernel: tpu_custom_call.1
= control target key start
LH: loop header
LB: loop body
LE: loop exit
PB: predicated region body
PF: predicated region fallthrough
CT: control target
= control target key end

     0   :  { %s968_s0 = inlined_call_operand.hbm [shape: f32[2,4,2,128], index: 0, kind: input, shape index: {}]   ;;  %s969_s1 = inlined_call_operand.hbm [shape: f32[2,4,2,128], index: 1, kind: input, shape index: {}]   ;;  %s970_s2 = inlined_call_operand.hbm [shape: f32[4,8,128], index: 2, kind: output, shape index: {}]  }
   0x1   :  { %975 = sst [smem:[#allocation18_spill]] %s968_s0 }
   0x2   :  { %7 = vsyncpa [#allocation6], 0 }
   0x3   :  { %9 = vsyncpa [#allocation6 + $0x1], 0 }
   0x4   :  { %10 = vsyncpa [#allocation9], 0 }
   0x5   :  { %12 = vsyncpa [#allocation9 + $0x1], 0 }
   0x6   :  { %13 = vsyncpa [#allocation7], 0 }
   0x7   :  { %15 = vsyncpa [#allocation7 + $0x1], 0  ;;  %s774_s9 = smov 0   ;;  %s776_s10 = smov 0  }
   0x8   :  { %s778_s11 = smov 0   ;;  %s780_s12 = smov 0  }
   0x9   :  { %s782_s13 = smov 0   ;;  %s784_s14 = smov 0  }
   0xa   :  { %s786_s15 = smov 0   ;;  %s788_s16 = smov 0  }
   0xb   :  { %s790_s17 = smov 0   ;;  %s792_s18 = smov 0  }
   0xc   :  { %s794_s19 = smov 0  }
   0xd LB: > { %976 = sst [smem:[#allocation14_spill]] %s748_s17  ;;  %s434_s20 = sadd.s32 4294967295, %s756_s19   ;;  %s756_s19 = sphi %s794_s19, %s21_s19   ;;  %s752_s18 = sphi %s792_s18, %s989_s18   ;;  %s748_s17 = sphi %s790_s17, %s988_s17   ;;  %s744_s16 = sphi %s788_s16, %s987_s16   ;;  %s740_s15 = sphi %s786_s15, %s986_s15   ;;  %s736_s14 = sphi %s784_s14, %s995_s14   ;;  %s732_s13 = sphi %s782_s13, %s994_s13   ;;  %s728_s12 = sphi %s780_s12, %s993_s12   ;;  %s724_s11 = sphi %s778_s11, %s992_s11   ;;  %s720_s10 = sphi %s776_s10, %s991_s10   ;;  %s716_s9 = sphi %s774_s9, %s990_s9  }
   0xe   : > { %977 = sst [smem:[#allocation15_spill]] %s752_s18  ;;  %s435_s21 = sadd.s32 4294967294, %s756_s19  }
   0xf   : > { %s36_s22 = sadd.s32 1, %s748_s17  ;;  %s40_s23 = sadd.s32 1, %s752_s18 }
  0x10   : > { %p38_p0 = scmp.ge.s32.totalorder %s36_s22, 2  ;;  %s51_s24 = sadd.s32 1, %s736_s14 }
  0x11   : > { %p58_p1 = scmp.ne.s32.totalorder %s736_s14, %s732_s13  ;;  %p59_p2 = scmp.eq.s32.totalorder %s756_s19, 0 }
  0x12   : > { %s997_s22 = smov (%p38_p0, %s36_s22), 0  ;;  %s999_s23 = smov (!%p38_p0, %s40_s23), %s752_s18 }
  0x13   : > { %978 = sst [smem:[#allocation16_spill]] %s997_s22  ;;  %s44_s25 = ssub.s32 %s748_s17, %s997_s22 }
  0x14   : > { %p840_p3 = por %p59_p2, %p58_p1  ;;  %p42_p4 = scmp.ge.s32.totalorder %s999_s23, 4 }
  0x15   : > { %p64_p5 = scmp.ne.s32.totalorder %s732_s13, %s728_s12  ;;  %p65_p6 = scmp.eq.s32.totalorder %s434_s20, 0 }
  0x16   : > { %s107_s27 = sadd.s32 1, %s724_s11  ;;  %s1001_s23 = smov (%p42_p4, %s999_s23), 0 }
  0x17   : > { %980 = sst [smem:[#allocation17_spill]] %s1001_s23  ;;  %p848_p7 = por %p65_p6, %p64_p5 }
  0x18   : > { %p117_p8 = scmp.ne.s32.totalorder %s724_s11, %s720_s10  ;;  %s45_s29 = ssub.s32 %s752_s18, %s1001_s23 }
  0x19   : > { %p118_p9 = scmp.eq.s32.totalorder %s434_s20, 7  ;;  %s46_s30 = sor.u32 %s45_s29, %s44_s25 }
  0x1a   : > { %p105_p10 = scmp.eq.s32.totalorder %s45_s29, 0  ;;  %p49_p11 = scmp.eq.s32.totalorder %s46_s30, 0 }
  0x1b   : > { %p856_p12 = por %p118_p9, %p117_p8  ;;  %p123_p13 = scmp.ne.s32.totalorder %s720_s10, %s716_s9 }
  0x1c   : > { %s861_s4 = scalar_select %p105_p10, %s724_s11, %s107_s27  }
  0x1d   : > { %s864_s5 = scalar_select %p49_p11, %s736_s14, %s51_s24  }
  0x1e   : > { %p124_p0 = scmp.eq.s32.totalorder %s435_s21, 7  ;;  %p479_p1 = scmp.lt.s32.totalorder %s756_s19, 8 }
  0x1f   : > { %s144_s7 = sand.u32 1, %s736_s14   ;;  %s439_s12 = sshll.u32 %s748_s17, 2 }
  0x20   : > { %p869_p2 = por %p124_p0, %p123_p13  ;;  %s438_s8 = sshll.u32 %s144_s7, 1 }
  0x21   : > { %s153_s20 = sadd.s32 %s752_s18, %s439_s12  ;;  %s148_s25 = scalar_lea.vmem [#allocation5], %s438_s8 }
  0x22   : > { %s159_s29 = sshll.u32 %s148_s25, 4  ;;  %s440_s30 = sshll.u32 %s153_s20, 1  ;;  %s160_s29 = int_to_ptr.vmem [resolvable:$true] %s159_s29 }
  0x23   : > { %s984_s0 = sld [smem:[#allocation18_spill]]  ;;  %p881_p4 = pnand %p479_p1, %p840_p3 }
  0x24   : > { %p444_p5 = scmp.ge.s32.totalorder %s756_s19, 1  ;;  %s145_s17 = scalar_lea.sflag [#allocation6], %s144_s7 }
  0x25   : > { %p186_p6 = scmp.lt.s32.totalorder %s756_s19, 9  ;;  %s177_s25 = scalar_lea.hbm %s969_s1, %s440_s30 }
  0x26   : > { %s179_s27 = sshll.u32 %s177_s25, 4  ;;  %s170_s26 = scalar_lea.vmem [#allocation8], %s438_s8  ;;  %s180_s27 = int_to_ptr.hbm [resolvable:$true] %s179_s27 }
  0x27   : > { %p187_p8 = pnand %p444_p5, %p186_p6  ;;  %s181_s24 = sshll.u32 %s170_s26, 4  ;;  %s182_s24 = int_to_ptr.vmem [resolvable:$true] %s181_s24 }
  0x29   : > { %s155_s23 = scalar_lea.hbm %s984_s0, %s440_s30  ;;  %s167_s0 = scalar_lea.sflag [#allocation9], %s144_s7 }
  0x2a   : > { %s157_s22 = sshll.u32 %s155_s23, 4  ;;  %190 = sbr.rel (%p187_p8) target bundleno = 279 (0x117), region = 28  ;;  %s158_s22 = int_to_ptr.hbm [resolvable:$true] %s157_s22 }
  0x2b   : > { %471 = dma.hbm_to_vmem [thread:$0]  (!%p881_p4), %s158_s22, 32, %s160_s29, %s145_s17  }
  0x2c   : > { %474 = dma.hbm_to_vmem [thread:$0]  (!%p881_p4), %s180_s27, 32, %s182_s24, %s167_s0  }
  0x2d   : > { %s192_s23 = sand.u32 (!%p187_p8), 1, %s732_s13  }
  0x2e   : > { %s445_s18 = sshll.u32 (!%p187_p8), %s192_s23, 1  ;;  %s193_s17 = scalar_lea.sflag (!%p187_p8), [#allocation6], %s192_s23 }
  0x2f   : > { %s196_s22 = scalar_lea.vmem [#allocation5], %s445_s18 }
  0x30   : > { %703 = dma.done.wait (%p848_p7), %s193_s17, 32  }
  0x31   : > { %705 = vsyncadd (%p848_p7), %s193_s17, 4294967264  ;;  %s203_s29 = scalar_lea.sflag [#allocation9], %s192_s23  ;;  %s206_s8 = scalar_lea.vmem [#allocation8], %s445_s18 }
  0x32   : > { %707 = dma.done.wait (%p848_p7), %s203_s29, 32  }
  0x33   : > { %709 = vsyncadd (%p848_p7), %s203_s29, 4294967264  ;;  %s230_s0 = sand.u32 1, %s720_s10   ;;  %p233_p3 = scmp.eq.s32.totalorder %s740_s15, 0 }
  0x34   : > { %s907_s7 = sshll.u32 %s230_s0, 3  ;;  %v758_v0 = vmov (%p233_p3), 0.0  }
  0x35   : > { %s232_s30 = scalar_lea.vmem [#allocation10], %s907_s7  ;;  %238 = sbr.rel (!%p233_p3) target bundleno = 58 (0x3a), region = 40  ;;  %239 = vst [vmem:[#allocation2] sm:$0x3] (%p233_p3), %v758_v0 }
  0x36   : > { %240 = vst [vmem:[#allocation3] sm:$0x3] (%p233_p3), %v758_v0 }
  0x37   : > { %241 = vst [vmem:[#allocation4] sm:$0x3] (%p233_p3), %v758_v0 }
  0x3a PF: > { %v242_v1 = vld [vmem:[%s196_s22] sm:$0x3]  ;;  %v243_v2 = vld [vmem:[%s206_s8] sm:$0x3]  ;;  %p254_p7 = scmp.eq.s32.totalorder %s740_s15, 1 }
  0x3b   : > { %v244_v4 = vmul.f32 %v243_v2, %v242_v1  ;;  %vm260_vm0 = vcmask (%p254_p7), 1041408   ;;  %v293_v37 = vlaneseq (%p254_p7) }
  0x3c   : > { %v245_v3 = vld [vmem:[#allocation2] sm:$0x3] }
  0x3d   : > { %v248_v5 = vld [vmem:[#allocation3] sm:$0x3]  ;;  %v246_v9 = vadd.f32 %v245_v3, %v244_v4  ;;  %258 = sbr.rel (!%p254_p7) target bundleno = 264 (0x108), region = 44  ;;  %v294_v38 = vshrl.u32 (%p254_p7), %v293_v37, 7 }
  0x3e   : > { %v251_v6 = vld [vmem:[#allocation4] sm:$0x3]  ;;  %v249_v7 = vadd.f32 %v248_v5, %v242_v1 }
  0x3f   : > { %v252_v8 = vadd.f32 %v251_v6, %v243_v2  ;;  %247 = vst [vmem:[#allocation2] sm:$0x3] %v246_v9  ;;  %vm297_vm1 = vcmp.eq.s32.totalorder (%p254_p7), %v294_v38, 2  ;;  %vm296_vm2 = vcmp.eq.s32.totalorder (%p254_p7), %v294_v38, 1  ;;  %vm295_vm3 = vcmp.eq.s32.totalorder (%p254_p7), %v294_v38, 0 }
  0x40   : > { %250 = vst [vmem:[#allocation3] sm:$0x3] %v249_v7 }
  0x41   : > { %253 = vst [vmem:[#allocation4] sm:$0x3] %v252_v8 }
  0x46   : > { %v259_v10 = vld [vmem:[#allocation2] sm:$0x3] }
  0x47   : > { %v261_v12 = vsel %vm260_vm0, %v259_v10, 0.0  ;;  %v271_v14 = vld [vmem:[#allocation3] sm:$0x3] }
  0x48   : > { %v282_v11 = vld [vmem:[#allocation4] sm:$0x3]  ;;  %262 = vadd.xlane.f32.xlu0 %v261_v12  ;;  %v272_v15 = vsel %vm260_vm0, %v271_v14, 0.0 }
  0x49   : > { %v283_v13 = vsel %vm260_vm0, %v282_v11, 0.0 }
  0x4a   : > { %284 = vadd.xlane.f32.xlu1 %v283_v13 }
  0x50   : > { %273 = vadd.xlane.f32.xlu0 %v272_v15 }
  0xbb   : > { %v263_v16 = vpop.xlane.xlu0 %262 }
  0xbc   : > { %v264_v18 = vrot.slane %v263_v16, 4 }
  0xbd   : > { %v285_v17 = vpop.xlane.xlu1 %284 }
  0xbe   : > { %v286_v19 = vrot.slane %v285_v17, 4  ;;  %v265_v20 = vadd.f32 %v264_v18, %v263_v16 }
  0xc0   : > { %v287_v21 = vadd.f32 %v286_v19, %v285_v17  ;;  %v266_v22 = vrot.slane %v265_v20, 2 }
  0xc2   : > { %v267_v23 = vadd.f32 %v266_v22, %v265_v20  ;;  %v288_v24 = vrot.slane %v287_v21, 2 }
  0xc3   : > { %v274_v25 = vpop.xlane.xlu0 %273 }
  0xc4   : > { %v275_v26 = vrot.slane %v274_v25, 4  ;;  %v268_v27 = vrot.slane %v267_v23, 1  ;;  %v289_v30 = vadd.f32 %v288_v24, %v287_v21 }
  0xc6   : > { %v276_v28 = vadd.f32 %v275_v26, %v274_v25  ;;  %v269_v29 = vadd.f32 %v268_v27, %v267_v23  ;;  %v290_v33 = vrot.slane %v289_v30, 1 }
  0xc8   : > { %v277_v31 = vrot.slane %v276_v28, 2  ;;  %456 = vpush %v269_v29  ;;  %v291_v36 = vadd.f32 %v290_v33, %v289_v30 }
  0xca   : > { %v278_v32 = vadd.f32 %v277_v31, %v276_v28 }
  0xcc   : > { %v279_v34 = vrot.slane %v278_v32, 1 }
  0xce   : > { %v280_v35 = vadd.f32 %v279_v34, %v278_v32 }
  0xd0   : > { %458 = vpush %v280_v35 }
  0xd1   : > { %460 = vpush %v291_v36 }
  0xf9   : > { %s457_s15 = spop %456 }
  0xfa   : > { %v302_v42 = vstv %s457_s15 }
 0x101   : > { %s459_s18 = spop %458 }
 0x102   : > { %v300_v39 = vstv %s459_s18  ;;  %s461_s28 = spop %460 }
 0x103   : > { %v298_v40 = vstv %s461_s28 }
 0x104   : > { %v299_v41 = vsel %vm297_vm1, %v298_v40, 0.0 }
 0x105   : > { %v301_v43 = vsel %vm296_vm2, %v300_v39, %v299_v41 }
 0x106   : > { %v303_v44 = vsel %vm295_vm3, %v302_v42, %v301_v43 }
 0x107   : > { %304 = vst [vmem:[%s232_s30] sm:$0xff] %v303_v44 }
 0x108 PF: > { %s451_s21 = sshll.u32 %s744_s16, 3  ;;  %s318_s27 = sshll.u32 %s232_s30, 4  ;;  %s319_s27 = int_to_ptr.vmem [resolvable:$true] %s318_s27 }
 0x109   : > { %s316_s25 = scalar_lea.hbm %s970_s2, %s451_s21  ;;  %s306_s24 = scalar_lea.sflag [#allocation7], %s230_s0 }
 0x10a   : > { %s320_s26 = sshll.u32 %s316_s25, 4  ;;  %s650_s29 = scalar_lea.hbm %s970_s2, 32  ;;  %s321_s26 = int_to_ptr.hbm [resolvable:$true] %s320_s26 }
 0x10b   : > { %s644_s23 = sshra.s32 %s321_s26, 4  ;;  %s645_s23 = int_to_ptr.hbm [resolvable:$true] %s644_s23 }
 0x10c   : > { %s646_s17 = scalar_lea.hbm %s645_s23, 8  ;;  %p651_p13 = scmp.lt.s32.totalorder %s645_s23, %s970_s2 }
 0x10d   : > { %p647_p9 = scmp.ne.s32.totalorder %s645_s23, %s646_s17  ;;  %p652_p0 = scmp.lt.s32.totalorder %s650_s29, %s646_s17 }
 0x10f   : > { %p648_p10 = pnand %p647_p9, %p856_p12  ;;  %p653_p1 = por %p652_p0, %p651_p13 }
 0x111   : > { %p649_p11 = pneg %p648_p10 }
 0x113   : > { %p654_p4 = pnand %p653_p1, %p649_p11 }
 0x115   : > { %657 = shalt.err (!%p654_p4)
}
 0x116   : > { %466 = dma.vmem_to_hbm [thread:$0]  (%p856_p12), %s319_s27, 128, %s321_s26, %s306_s24  }
 0x117 PF: > { %p480_p5 = scmp.ge.s32.totalorder %s756_s19, 2  ;;  %s332_s0 = sand.u32 1, %s716_s9  }
 0x118   : > { %s333_s7 = scalar_lea.sflag [#allocation7], %s332_s0 }
 0x119   : > { %p476_p6 = pnand %p480_p5, %p869_p2 }
 0x11b   : > { %p477_p8 = pneg %p476_p6 }
 0x11d   : > { %711 = dma.done.wait (%p477_p8), %s333_s7, 128  }
 0x11e   : > { %713 = vsyncadd (%p477_p8), %s333_s7, 4294967168  ;;  %s21_s19 = sadd.s32 1, %s756_s19   ;;  %s986_s15 = sld [smem:[#allocation14_spill]] }
 0x11f   : > { %p18_p3 = scmp.ge.s32.totalorder %s21_s19, 10   ;;  %s987_s16 = sld [smem:[#allocation15_spill]] }
 0x120   : > { %s988_s17 = sld [smem:[#allocation16_spill]]  ;;  %s990_s9 = smov %s720_s10 }
 0x121   : > { %s989_s18 = sld [smem:[#allocation17_spill]]  ;;  %s991_s10 = smov %s724_s11 }
 0x122   : > { %s992_s11 = smov %s861_s4  ;;  %s993_s12 = smov %s732_s13 }
 0x123   : > { %s994_s13 = smov %s736_s14  ;;  %s995_s14 = smov %s864_s5 }
 0x124   :  { %20 = sbr.rel (!%p18_p3) target bundleno = 13 (0xd), region = 94 }
 0x129   :  { %339 = vsyncpa [#allocation6], 1 }
 0x12a   :  { %341 = vsyncpa [#allocation6 + $0x1], 1 }
 0x12b   :  { %342 = vsyncpa [#allocation9], 1 }
 0x12c   :  { %344 = vsyncpa [#allocation9 + $0x1], 1 }
 0x12d   :  { %345 = vsyncpa [#allocation7], 1 }
 0x12e   :  { %347 = vsyncpa [#allocation7 + $0x1], 1 }

</bundles_post_ra>
